<compile_context>
chip_gen: v7x
topology: tpu7x:2x2x1
jax: 0.10.0
libtpu: 0.0.40
codegen_flags: <defaults>
</compile_context>

<pallas_src>
import functools
import math

import numpy as np

import jax
import jax.numpy as jnp
from jax import lax
from jax.experimental import pallas as pl
from jax.experimental.pallas import tpu as pltpu


# ----------------------------------------------------------------------------
# Deterministic parameter initialization (Gabor.get_mel_init_parameters)
# ----------------------------------------------------------------------------
def _hz_to_mel(f):
    return 2595.0 * np.log10(1.0 + f / 700.0)


def _mel_to_hz(m):
    return 700.0 * (10.0 ** (m / 2595.0) - 1.0)


def melscale_fbanks(n_freqs, f_min, f_max, n_mels, sample_rate):
    # Equivalent of torchaudio.functional.melscale_fbanks (htk scale, norm=None).
    all_freqs = np.linspace(0.0, sample_rate // 2, n_freqs)
    m_pts = np.linspace(_hz_to_mel(f_min), _hz_to_mel(f_max), n_mels + 2)
    f_pts = _mel_to_hz(m_pts)
    f_diff = f_pts[1:] - f_pts[:-1]                      # (n_mels+1,)
    slopes = f_pts[None, :] - all_freqs[:, None]         # (n_freqs, n_mels+2)
    down = -slopes[:, :-2] / f_diff[:-1]
    up = slopes[:, 2:] / f_diff[1:]
    return np.maximum(0.0, np.minimum(down, up))          # (n_freqs, n_mels)


def mel_init_parameters(num_filters, n_coefficients, sample_rate, f_min, f_max):
    fb = melscale_fbanks(n_coefficients // 2 + 1, f_min, f_max, num_filters, sample_rate)
    sqrt_filters = np.sqrt(fb)
    peaks = sqrt_filters.max(axis=0)
    center_idx = sqrt_filters.argmax(axis=0)
    center_frequencies = 2.0 * np.pi * (center_idx / n_coefficients)
    half_magnitudes = peaks / 2.0
    width = (sqrt_filters >= half_magnitudes[None, :]).astype(np.float64).sum(axis=0)
    sqrt_2ln2 = math.sqrt(2.0 * math.log(2.0))
    inverse_bandwidths = sqrt_2ln2 * n_coefficients / (width * np.pi)
    return (center_frequencies.astype(np.float32),
            inverse_bandwidths.astype(np.float32))


def _round_up(x, m):
    return ((x + m - 1) // m) * m


# ----------------------------------------------------------------------------
# Pallas kernel 1 (one-shot): clamp params -> Gabor impulse responses W (2F, K)
# ----------------------------------------------------------------------------
def _gabor_filter_kernel(cf_ref, bw_ref, w_ref, *, num_taps, t_start,
                         min_bw, max_bw, max_cf):
    # cf_ref, bw_ref : (F, 1) f32 learnable params ; w_ref : (2F, K) f32
    bw = jnp.clip(bw_ref[...], min_bw, max_bw)            # (F, 1)
    cf = jnp.clip(cf_ref[...], 0.0, max_cf)               # (F, 1)
    t = (lax.broadcasted_iota(jnp.int32, (1, num_taps), 1).astype(jnp.float32)
         + jnp.float32(t_start))                          # (1, K)
    norm = 1.0 / (jnp.sqrt(2.0 * jnp.pi) * bw)            # (F, 1)
    gauss = jnp.exp(-(t * t) / (2.0 * bw * bw))           # (F, K)
    phase = cf * t                                        # (F, K)
    envelope = norm * gauss
    w_ref[...] = jnp.concatenate(
        [envelope * jnp.cos(phase), envelope * jnp.sin(phase)], axis=0)   # (2F, K)


# ----------------------------------------------------------------------------
# Pallas kernel 2 (hot loop): im2col into VMEM scratch + MXU matmul
# ----------------------------------------------------------------------------
def _tap_slice(x_ref, b, start, tile_l, stride):
    if stride == 1:
        return x_ref[pl.ds(b, 1), pl.ds(start, tile_l)]
    # TODO(synk): strided lane reads are XLU-heavy; a contiguous load +
    # in-register subsample would be cheaper for stride > 1 (default stride=1).
    return x_ref[pl.ds(b, 1), pl.ds(start, tile_l, stride=stride)]


def _gabor_conv_kernel(w_ref, x_ref, real_ref, imag_ref, frames_ref, *,
                       num_filters, num_taps, stride, block_rows, tile_l,
                       single_l_tile):
    # w_ref      : (2F, K)          precomputed real/imag impulse responses
    # x_ref      : (Bt, Lx_pad)     block of signal rows (full padded length,
    #                               DMA'd once per row tile; reused across L tiles)
    # real_ref   : (Bt, F, TILE_L)  planar real output tile (lane-dense)
    # imag_ref   : (Bt, F, TILE_L)  planar imag output tile (lane-dense)
    # frames_ref : (K, TILE_L)      im2col scratch, reused per row
    if single_l_tile:
        base = 0                                          # fully static slice starts
    else:
        base = pl.multiple_of(pl.program_id(1) * tile_l * stride, 128)

    w = w_ref[...]                                        # (2F, K)

    for b in range(block_rows):                           # static, block_rows <= 8
        # im2col: frames[k, i] = x[b, base + i*stride + k]
        if num_taps <= 64:
            for k in range(num_taps):                     # static unroll (short filters)
                frames_ref[pl.ds(k, 1), :] = _tap_slice(x_ref, b, base + k,
                                                        tile_l, stride)
        else:
            def fill(k, carry):                           # long filters: no code blowup
                frames_ref[pl.ds(k, 1), :] = _tap_slice(x_ref, b, base + k,
                                                        tile_l, stride)
                return carry
            lax.fori_loop(0, num_taps, fill, 0)

        # conv1d (valid cross-correlation) as one MXU matmul per row.
        res = jnp.dot(w, frames_ref[...], preferred_element_type=jnp.float32)  # (2F, TILE_L)
        real_ref[b, :, :] = res[:num_filters, :]
        imag_ref[b, :, :] = res[num_filters:, :]


# ----------------------------------------------------------------------------
# Wrapper
# ----------------------------------------------------------------------------
def gabor_forward(x, center_frequencies, inverse_bandwidths, *,
                  n_coefficients, causal=False, stride=1):
    """Forward pass of Gabor (use_complex_convolution=False -> RealImagGaborFilter)."""
    B, C, L = x.shape
    BC = B * C
    F = int(center_frequencies.shape[0])

    # t = arange(-n // 2, (n + 1) // 2)  -- reproduces the torch arange exactly.
    t_start = (-n_coefficients) // 2
    t_end = (n_coefficients + 1) // 2
    num_taps = t_end - t_start

    x2 = x.reshape(BC, L).astype(jnp.float32)
    if causal:
        # Module semantics: RealImagGaborFilter.padding = filter_length - 1.
        pad_left = n_coefficients - 1
        x2 = jnp.pad(x2, ((0, 0), (pad_left, 0)))
        L = L + pad_left
    L_out = (L - num_taps) // stride + 1
    if L_out <= 0:
        raise ValueError("input too short for the Gabor filter length")

    # --- tiling: lane-dense L_out tiles (multiple of 128), up to 8 rows per step ---
    tile_l = min(512, _round_up(L_out, 128))
    l_out_pad = _round_up(L_out, tile_l)
    n_l_tiles = l_out_pad // tile_l

    block_rows = BC if BC <= 8 else 8
    bc_pad = _round_up(BC, block_rows)
    n_row_tiles = bc_pad // block_rows

    lx_need = (l_out_pad - 1) * stride + num_taps
    lx_pad = _round_up(max(L, lx_need), 128)
    x2 = jnp.pad(x2, ((0, bc_pad - BC), (0, lx_pad - L)))   # zero pad rows + tail

    # --- clamp params and build W once (hoisted out of the per-row hot loop) ---
    sqrt_2ln2 = math.sqrt(2.0 * math.log(2.0))
    min_bw = 4.0 * sqrt_2ln2 / math.pi
    max_bw = 2.0 * n_coefficients * sqrt_2ln2 / math.pi
    max_cf = math.pi
    cf = jnp.asarray(center_frequencies, jnp.float32).reshape(F, 1)
    bw = jnp.asarray(inverse_bandwidths, jnp.float32).reshape(F, 1)

    w = pl.pallas_call(
        functools.partial(_gabor_filter_kernel, num_taps=num_taps,
                          t_start=float(t_start), min_bw=float(min_bw),
                          max_bw=float(max_bw), max_cf=float(max_cf)),
        out_shape=jax.ShapeDtypeStruct((2 * F, num_taps), jnp.float32),
    )(cf, bw)

    # --- main kernel: im2col + matmul over a (row-tile, L_out-tile) grid ---
    conv_kernel = functools.partial(
        _gabor_conv_kernel, num_filters=F, num_taps=num_taps, stride=stride,
        block_rows=block_rows, tile_l=tile_l, single_l_tile=(n_l_tiles == 1))

    real, imag = pl.pallas_call(
        conv_kernel,
        out_shape=(jax.ShapeDtypeStruct((bc_pad, F, l_out_pad), jnp.float32),
                   jax.ShapeDtypeStruct((bc_pad, F, l_out_pad), jnp.float32)),
        grid_spec=pltpu.PrefetchScalarGridSpec(
            num_scalar_prefetch=0,
            grid=(n_row_tiles, n_l_tiles),
            in_specs=[
                # W: constant block index -> fetched once, stays VMEM resident.
                pl.BlockSpec((2 * F, num_taps), lambda i, j: (0, 0)),
                # x rows: block index independent of j -> one DMA per row tile.
                pl.BlockSpec((block_rows, lx_pad), lambda i, j: (i, 0)),
            ],
            out_specs=[
                pl.BlockSpec((block_rows, F, tile_l), lambda i, j: (i, 0, j)),
                pl.BlockSpec((block_rows, F, tile_l), lambda i, j: (i, 0, j)),
            ],
            scratch_shapes=[pltpu.VMEM((num_taps, tile_l), jnp.float32)],
        ),
        compiler_params=pltpu.CompilerParams(
            dimension_semantics=("parallel", "parallel"),
            vmem_limit_bytes=32 * 1024 * 1024),
    )(w, x2)

    # Single pass to complex64 from the planar outputs (pad sliced off here).
    out = lax.complex(real[:BC, :, :L_out], imag[:BC, :, :L_out])
    if C > 1:
        out = out.reshape(B, C, F, L_out)
    return out


# ----------------------------------------------------------------------------
# Pure numpy reference (same math as the PyTorch module) for verification
# ----------------------------------------------------------------------------
def _reference(x, cf, bw, n_coefficients, stride=1):
    x = np.asarray(x, np.float64)
    cf = np.asarray(cf, np.float64)
    bw = np.asarray(bw, np.float64)
    sqrt_2ln2 = math.sqrt(2.0 * math.log(2.0))
    bw = np.clip(bw, 4.0 * sqrt_2ln2 / math.pi, 2.0 * n_coefficients * sqrt_2ln2 / math.pi)
    cf = np.clip(cf, 0.0, math.pi)
    t = np.arange((-n_coefficients) // 2, (n_coefficients + 1) // 2, dtype=np.float64)
    norm = (1.0 / (math.sqrt(2.0 * math.pi) * bw))[:, None]
    gauss = np.exp(-t[None, :] ** 2 / (2.0 * bw[:, None] ** 2))
    wr = norm * gauss * np.cos(cf[:, None] * t[None, :])
    wi = norm * gauss * np.sin(cf[:, None] * t[None, :])
    B, C, L = x.shape
    xf = x.reshape(B * C, L)
    win = np.lib.stride_tricks.sliding_window_view(xf, t.size, axis=-1)[:, ::stride, :]
    yr = np.einsum('blk,fk->bfl', win, wr)
    yi = np.einsum('blk,fk->bfl', win, wi)
    out = yr + 1j * yi
    if C > 1:
        out = out.reshape(B, C, out.shape[-2], out.shape[-1])
    return out


if __name__ == "__main__":
    # Small config consistent with the module (mel init, real/imag conv,
    # non-causal, stride=1, input (batch, 1, num_samples)).
    num_filters = 8
    n_coefficients = 25     # -> 26 taps (reproduces the torch arange off-by-one for odd n)
    sample_rate = 16000
    B, C, L = 2, 1, 512

    cf_np, bw_np = mel_init_parameters(num_filters, n_coefficients, sample_rate,
                                       f_min=60.0, f_max=7800.0)

    key = jax.random.PRNGKey(0)
    x = jax.random.normal(key, (B, C, L), dtype=jnp.float32)

    out = gabor_forward(x, jnp.asarray(cf_np), jnp.asarray(bw_np),
                        n_coefficients=n_coefficients, causal=False, stride=1)
    out = jax.block_until_ready(out)

    ref = _reference(np.asarray(x), cf_np, bw_np, n_coefficients, stride=1)
    assert out.shape == ref.shape, (out.shape, ref.shape)
    assert out.dtype == jnp.complex64
    np.testing.assert_allclose(np.asarray(out), ref, rtol=3e-3, atol=3e-3)

    print("KERNEL_OK")
</pallas_src>

<mosaic_0001>
module attributes {stable_mosaic.version = 11 : i64} {
  func.func @_gabor_filter_kernel(%arg0: memref<8x1xf32, #tpu.memory_space<vmem>>, %arg1: memref<8x1xf32, #tpu.memory_space<vmem>>, %arg2: memref<16x26xf32, #tpu.memory_space<vmem>>) attributes {dimension_semantics = [], scalar_prefetch = 0 : i64, scratch_operands = 0 : i64, tpu.core_type = #tpu.core_type<tc>} {
    %c0 = arith.constant 0 : index
    %c0_0 = arith.constant 0 : index
    %0 = vector.load %arg1[%c0, %c0_0] : memref<8x1xf32, #tpu.memory_space<vmem>>, vector<8x1xf32>
    %cst = arith.constant 1.499125 : f32
    %cst_1 = arith.constant 18.7390633 : f32
    %1 = vector.broadcast %cst : f32 to vector<8x1xf32>
    %2 = arith.maximumf %1, %0 : vector<8x1xf32>
    %3 = vector.broadcast %cst_1 : f32 to vector<8x1xf32>
    %4 = arith.minimumf %3, %2 : vector<8x1xf32>
    %c0_2 = arith.constant 0 : index
    %c0_3 = arith.constant 0 : index
    %5 = vector.load %arg0[%c0_2, %c0_3] : memref<8x1xf32, #tpu.memory_space<vmem>>, vector<8x1xf32>
    %cst_4 = arith.constant 0.000000e+00 : f32
    %cst_5 = arith.constant 3.14159274 : f32
    %6 = vector.broadcast %cst_4 : f32 to vector<8x1xf32>
    %7 = arith.maximumf %6, %5 : vector<8x1xf32>
    %8 = vector.broadcast %cst_5 : f32 to vector<8x1xf32>
    %9 = arith.minimumf %8, %7 : vector<8x1xf32>
    %10 = tpu.iota {dimensions = array<i32: 1>} : vector<1x26xi32>
    %11 = arith.sitofp %10 : vector<1x26xi32> to vector<1x26xf32>
    %cst_6 = arith.constant -1.300000e+01 : f32
    %12 = vector.broadcast %cst_6 : f32 to vector<1x26xf32>
    %13 = arith.addf %11, %12 : vector<1x26xf32>
    %cst_7 = arith.constant 6.28318548 : f32
    %14 = math.sqrt %cst_7 : f32
    %15 = vector.broadcast %14 : f32 to vector<8x1xf32>
    %16 = arith.mulf %15, %4 : vector<8x1xf32>
    %cst_8 = arith.constant 1.000000e+00 : f32
    %17 = vector.broadcast %cst_8 : f32 to vector<8x1xf32>
    %18 = arith.divf %17, %16 : vector<8x1xf32>
    %19 = arith.mulf %13, %13 : vector<1x26xf32>
    %cst_9 = arith.constant 0.000000e+00 : f32
    %20 = vector.broadcast %cst_9 : f32 to vector<1x26xf32>
    %21 = arith.subf %20, %19 : vector<1x26xf32>
    %cst_10 = arith.constant 2.000000e+00 : f32
    %22 = vector.broadcast %cst_10 : f32 to vector<8x1xf32>
    %23 = arith.mulf %22, %4 : vector<8x1xf32>
    %24 = arith.mulf %23, %4 : vector<8x1xf32>
    %25 = vector.broadcast %21 : vector<1x26xf32> to vector<8x26xf32>
    %26 = vector.broadcast %24 : vector<8x1xf32> to vector<8x26xf32>
    %27 = arith.divf %25, %26 : vector<8x26xf32>
    %28 = math.exp %27 : vector<8x26xf32>
    %29 = vector.broadcast %9 : vector<8x1xf32> to vector<8x26xf32>
    %30 = vector.broadcast %13 : vector<1x26xf32> to vector<8x26xf32>
    %31 = arith.mulf %29, %30 : vector<8x26xf32>
    %32 = vector.broadcast %18 : vector<8x1xf32> to vector<8x26xf32>
    %33 = arith.mulf %32, %28 : vector<8x26xf32>
    %34 = math.cos %31 : vector<8x26xf32>
    %35 = arith.mulf %33, %34 : vector<8x26xf32>
    %36 = math.sin %31 : vector<8x26xf32>
    %37 = arith.mulf %33, %36 : vector<8x26xf32>
    %38 = tpu.concatenate %35, %37 in 0 : vector<8x26xf32>, vector<8x26xf32> -> vector<16x26xf32>
    %c0_11 = arith.constant 0 : index
    %c0_12 = arith.constant 0 : index
    %39 = vector.load %arg2[%c0_11, %c0_12] : memref<16x26xf32, #tpu.memory_space<vmem>>, vector<16x26xf32>
    tpu.vector_store %arg2[%c0_11, %c0_12], %38 {strides = array<i32>} : memref<16x26xf32, #tpu.memory_space<vmem>>, vector<16x26xf32>,
    return
  }
}

</mosaic_0001>

<bundles_post_ra>
// kernel: tpu_custom_call.1
= control target key start
LH: loop header
LB: loop body
LE: loop exit
PB: predicated region body
PF: predicated region fallthrough
CT: control target
= control target key end

     0   :  { %v336_v2 = vmov 0   ;;  %s405_s0 = inlined_call_operand.vmem [shape: f32[8,1], index: 0, kind: input, shape index: {}]   ;;  %s406_s1 = inlined_call_operand.vmem [shape: f32[8,1], index: 1, kind: input, shape index: {}]   ;;  %s407_s2 = inlined_call_operand.hbm [shape: f32[16,26], index: 2, kind: output, shape index: {}]  }
   0x1   :  { %v15_v0 = vld [vmem:[%s405_s0] sm:$0xff]  ;;  %300 = vset.pattern.permute.xlu0 %v336_v2  ;;  %301 = vset.pattern.permute.xlu1 %v336_v2 }
   0x2   :  { %v12_v1 = vld [vmem:[%s406_s1] sm:$0xff]  ;;  %v16_v3 = vmax.f32 %v15_v0, 0.0 }
   0x3   :  { %v13_v4 = vmax.f32 %v12_v1, 1.499125 }
   0x4   :  { %v17_v5 = vmin.f32 %v16_v3, 3.1415927 }
   0x5   :  { %v14_v6 = vmin.f32 %v13_v4, 18.739063 }
   0x6   :  { %7 = vsyncpa [#allocation3], 0  ;;  %40 = vperm.xlu0 %300, %v17_v5   ;;  %v18_v11 = vlaneseq  ;;  %v337_v27 = vmov 683565275   ;;  %v338_v29 = vmov 2475754826  }
   0x7   :  { %v27_v7 = vmul.f32 2.0, %v14_v6  ;;  %v22_v8 = vmul.f32 2.5066283, %v14_v6  ;;  %v339_v32 = vmov 2131351028   ;;  %s343_s0 = smov [#allocation2]  }
   0x8   :  { %v19_v12 = vand.u32 127, %v18_v11  ;;  %v340_v35 = vmov 2102212464   ;;  %v341_v38 = vmov 920167782   ;;  %s267_s1 = sshll.u32 %s343_s0, 4  ;;  %s268_s1 = int_to_ptr.vmem [resolvable:$true] %s267_s1 }
   0x9   :  { %v28_v9 = vmul.f32 %v27_v7, %v14_v6  ;;  %302 = vrcp.f32 %v22_v8  ;;  %v342_v41 = vmov 1326507024   ;;  %s312_s13 = scalar_lea.vmem %s268_s1, 256  ;;  %p317_p1 = scmp.lt.s32.totalorder %s268_s1, %s268_s1 }
   0xa   :  { %v20_v13 = vcvt.s32.f32 %v19_v12  ;;  %p313_p0 = scmp.ne.s32.totalorder %s268_s1, %s312_s13  ;;  %p318_p2 = scmp.lt.s32.totalorder %s312_s13, %s312_s13 }
   0xb   :  { %31 = vperm.xlu0 %300, %v28_v9  }
   0xc   :  { %v367_v14 = vadd.f32 -13.0, %v20_v13  ;;  %p319_p3 = por %p318_p2, %p317_p1 }
   0xe   :  { %p320_p4 = pnand %p319_p3, %p313_p0 }
  0x13   :  { %v303_v10 = vpop.eup %302 }
  0x14   :  { %46 = vperm.xlu1 %301, %v303_v10  }
  0x85   :  { %v41_v15 = vpop.permute.xlu0 %40 }
  0x86   :  { %v370_v16 = vmul.f32 %v41_v15, %v367_v14 }
  0x88   :  { %v53_v17 = vand.u32 2139095040, %v370_v16  ;;  %v50_v21 = vand.u32 2147483647, %v370_v16  ;;  %vm52_vm7 = vcmp.lt.s32.totalorder %v370_v16, 0  ;;  %vm142_vm15 = vweird.f32 %v370_v16 }
  0x8a   :  { %v54_v18 = vshrl.u32 %v53_v17, 23  ;;  %v57_v24 = vand.u32 8388607, %v50_v21  ;;  %v32_v15 = vpop.permute.xlu0 %31  ;;  %vm51_vm8 = vcmp.le.f32.partialorder %v50_v21, 0.7853982 }
  0x8b   :  { %304 = vrcp.f32 %v32_v15 }
  0x8c   :  { %v278_v19 = vadd.s32 4294967169, %v54_v18  ;;  %v58_v43 = vor.u32 8388608, %v57_v24 }
  0x8e   :  { %v60_v20 = vadd.s32 1, %v278_v19  ;;  %v98_v57 = vshll.u32 %v58_v43, 8 }
  0x90   :  { %vm61_vm0 = vcmp.gt.s32.totalorder %v60_v20, 0 }
  0x91   :  { %v62_v22 = vsel %vm61_vm0, %v60_v20, 0  ;;  %vm259_vm0 = vcmask 211968  }
  0x92   :  { %v64_v23 = vand.u32 31, %v62_v22  ;;  %v63_v26 = vshrl.u32 %v62_v22, 5 }
  0x93   :  { %v47_v21 = vpop.permute.xlu1 %46 }
  0x94   :  { %v65_v25 = vsub.s32 32, %v64_v23  ;;  %v67_v28 = vshll.u32 %v337_v27, %v64_v23  ;;  %v70_v30 = vshll.u32 %v338_v29, %v64_v23  ;;  %v73_v34 = vshll.u32 %v339_v32, %v64_v23 }
  0x95   :  { %v76_v37 = vshll.u32 %v340_v35, %v64_v23  ;;  %v79_v40 = vshll.u32 %v341_v38, %v64_v23  ;;  %vm82_vm1 = vcmp.lt.s32.totalorder %v63_v26, 1  ;;  %vm85_vm2 = vcmp.lt.s32.totalorder %v63_v26, 4 }
  0x96   :  { %v68_v31 = vshrl.u32 %v338_v29, %v65_v25  ;;  %v71_v33 = vshrl.u32 %v339_v32, %v65_v25  ;;  %v74_v36 = vshrl.u32 %v340_v35, %v65_v25  ;;  %v77_v39 = vshrl.u32 %v341_v38, %v65_v25 }
  0x97   :  { %v80_v42 = vshrl.u32 %v342_v41, %v65_v25  ;;  %v66_v52 = vshrl.u32 %v337_v27, %v65_v25  ;;  %vm84_vm3 = vcmp.lt.s32.totalorder %v63_v26, 3  ;;  %vm83_vm4 = vcmp.lt.s32.totalorder %v63_v26, 2 }
  0x98   :  { %v69_v44 = vor.u32 %v68_v31, %v67_v28  ;;  %v72_v45 = vor.u32 %v71_v33, %v70_v30  ;;  %v75_v46 = vor.u32 %v74_v36, %v73_v34  ;;  %v78_v47 = vor.u32 %v77_v39, %v76_v37  ;;  %v305_v31 = vpop.eup %304 }
  0x99   :  { %v81_v48 = vor.u32 %v80_v42, %v79_v40  ;;  %v25_v23 = vmul.f32 %v367_v14, %v367_v14 }
  0x9a   :  { %v87_v49 = vsel %vm85_vm2, %v75_v46, 2102212464  ;;  %v90_v50 = vsel %vm82_vm1, %v69_v44, %v72_v45  ;;  %v94_v51 = vsel %vm82_vm1, %v72_v45, %v75_v46  ;;  %v91_v53 = vsel %vm85_vm2, %v78_v47, 920167782 }
  0x9b   :  { %v95_v54 = vsel %vm85_vm2, %v81_v48, 1326507024  ;;  %v92_v55 = vsel %vm84_vm3, %v75_v46, %v91_v53  ;;  %v86_v58 = vsel %vm82_vm1, %v66_v52, %v69_v44  ;;  %v88_v59 = vsel %vm84_vm3, %v72_v45, %v87_v49 }
  0x9c   :  { %v96_v56 = vsel %vm84_vm3, %v78_v47, %v95_v54  ;;  %v93_v60 = vsel %vm83_vm4, %v90_v50, %v92_v55  ;;  %v89_v2 = vsel %vm83_vm4, %v86_v58, %v88_v59  ;;  %v26_v29 = vsub.f32 0.0, %v25_v23 }
  0x9d   :  { %v97_v61 = vsel %vm83_vm4, %v94_v51, %v96_v56  ;;  %v379_v0 = vmul.u32.u64.low %v98_v57, %v93_v60  ;;  %v380_v1 = vmul.u32.u64.high %v98_v57, %v93_v60, %v379_v0  ;;  %v105_v4 = vmul.u32 %v98_v57, %v89_v2 }
  0x9e   :  { %v376_v62 = vmul.u32.u64.low %v98_v57, %v97_v61  ;;  %v377_v63 = vmul.u32.u64.high %v98_v57, %v97_v61, %v376_v62  ;;  %v35_v35 = vmul.f32 %v305_v31, %v26_v29 }
  0x9f   :  { %v108_v3 = vadd.s32 1, %v380_v1 }
  0xa0   :  { %vm107_vm5 = vc.u32 %v377_v63, %v379_v0  ;;  %v106_v19 = vadd.s32 %v379_v0, %v377_v63  ;;  %v36_v38 = vmul.f32 1.442695, %v35_v35 }
  0xa1   :  { %v109_v5 = vsel %vm107_vm5, %v108_v3, %v380_v1 }
  0xa2   :  { %v110_v6 = vadd.s32 %v109_v5, %v105_v4 }
  0xa4   :  { %v111_v7 = vadd.s32 536870912, %v110_v6 }
  0xa6   :  { %v112_v8 = vshrl.u32 %v111_v7, 30 }
  0xa8   :  { %v113_v9 = vshll.u32 %v112_v8, 30  ;;  %v136_v36 = vsub.s32 4, %v112_v8 }
  0xaa   :  { %v114_v10 = vsub.s32 %v110_v6, %v113_v9  ;;  %v137_v39 = vsel %vm52_vm7, %v136_v36, %v112_v8 }
  0xab   :  { %v139_v41 = vsel %vm51_vm8, 0, %v137_v39 }
  0xac   :  { %v116_v11 = vsub.s32 0, %v114_v10  ;;  %v247_v42 = vadd.s32 3, %v139_v41  ;;  %v143_v43 = vand.u32 3, %v139_v41 }
  0xae   :  { %v279_v12 = vmin.u32 %v116_v11, %v114_v10  ;;  %v248_v44 = vand.u32 3, %v247_v42  ;;  %vm148_vm9 = vcmp.eq.s32.totalorder %v143_v43, 2  ;;  %vm145_vm11 = vcmp.eq.s32.totalorder %v143_v43, 0 }
  0xaf   :  { %vm144_vm13 = vcmp.lt.s32.totalorder %v143_v43, 2 }
  0xb0   :  { %v118_v13 = vclz %v279_v12  ;;  %vm253_vm10 = vcmp.eq.s32.totalorder %v248_v44, 2  ;;  %vm250_vm12 = vcmp.eq.s32.totalorder %v248_v44, 0  ;;  %vm249_vm14 = vcmp.lt.s32.totalorder %v248_v44, 2 }
  0xb2   :  { %v280_v17 = vadd.s32 4294967294, %v118_v13 }
  0xb4   :  { %vm281_vm6 = vcmp.lt.s32.totalorder %v280_v17, 0 }
  0xb5   :  { %v121_v18 = vsel %vm281_vm6, 0, %v280_v17 }
  0xb6   :  { %v122_v20 = vsub.s32 32, %v121_v18  ;;  %v126_v22 = vsub.s32 4294967266, %v121_v18  ;;  %v123_v24 = vshll.u32 %v114_v10, %v121_v18 }
  0xb8   :  { %v124_v25 = vshrl.u32 %v106_v19, %v122_v20  ;;  %v127_v26 = vadd.s32 127, %v126_v22 }
  0xba   :  { %v125_v27 = vor.u32 %v124_v25, %v123_v24  ;;  %v128_v28 = vshll.u32 %v127_v26, 23 }
  0xbc   :  { %v129_v30 = vor.u32 4788187, %v128_v28  ;;  %v132_v33 = vcvt.s32.f32 %v125_v27 }
  0xbe   :  { %v130_v32 = vand.u32 2147483647, %v129_v30 }
  0xc0   :  { %v133_v34 = vmul.f32 %v132_v33, %v130_v32 }
  0xc2   :  { %v134_v37 = vxor.u32 2147483648, %v133_v34 }
  0xc4   :  { %v135_v14 = vsel %vm52_vm7, %v134_v37, %v133_v34 }
  0xc5   :  { %v138_v40 = vsel %vm51_vm8, %v370_v16, %v135_v14 }
  0xc6   :  { %306 = vcosq.f32 %v138_v40 }
  0xc7   :  { %308 = vsinq.f32 %v138_v40 }
  0xc8   :  { %310 = vpow2.f32 %v36_v38 }
  0xd0   :  { %v307_v45 = vpop.eup %306 }
  0xd1   :  { %v309_v46 = vpop.eup %308  ;;  %v149_v47 = vxor.u32 2147483648, %v307_v45 }
  0xd2   :  { %v311_v48 = vpop.eup %310  ;;  %v146_v49 = vxor.u32 2147483648, %v309_v46 }
  0xd3   :  { %v150_v50 = vsel %vm148_vm9, %v149_v47, %v309_v46  ;;  %v255_v51 = vsel %vm253_vm10, %v149_v47, %v309_v46  ;;  %v49_v56 = vmul.f32 %v311_v48, %v47_v21 }
  0xd4   :  { %v147_v52 = vsel %vm145_vm11, %v307_v45, %v146_v49  ;;  %v252_v53 = vsel %vm250_vm12, %v307_v45, %v146_v49 }
  0xd5   :  { %v151_v54 = vsel %vm144_vm13, %v147_v52, %v150_v50  ;;  %v256_v55 = vsel %vm249_vm14, %v252_v53, %v255_v51 }
  0xd6   :  { %v152_v57 = vsel %vm142_vm15, nan, %v151_v54  ;;  %v257_v58 = vsel %vm142_vm15, nan, %v256_v55 }
  0xd7   :  { %v153_v59 = vmul.f32 %v152_v57, %v49_v56  ;;  %v258_v60 = vmul.f32 %v257_v58, %v49_v56 }
  0xd9   :  { %260 = vst.msk [vmem:[#allocation2] sm:$0xff] %vm259_vm0, %v153_v59  ;;  %261 = vst.msk [vmem:[#allocation2 + $0x8] sm:$0xff] %vm259_vm0, %v258_v60 }
  0xda   :  { %323 = shalt.err (!%p320_p4)
}
  0xdb   :  { %s324_s16 = scalar_lea.hbm %s407_s2, 256 }
  0xdc   :  { %p325_p5 = scmp.ne.s32.totalorder %s407_s2, %s324_s16  ;;  %p328_p6 = scmp.lt.u32.totalorder %s324_s16, %s407_s2 }
  0xde   :  { %p330_p7 = pnand %p328_p6, %p325_p5 }
  0xe0   :  { %333 = shalt.err (!%p330_p7)
}
  0xe1   :  { %s344_s21 = smov 128   ;;  %s345_s22 = smov 8  }
  0xe2   :  { %273 = dma.vmem_to_hbm [thread:$0]  %s268_s1, 256, %s407_s2, [#allocation3], %s344_s21, %s344_s21, %s345_s22  }
  0xe3   :  { %334 = dma.done.wait [#allocation3], 256  }
  0xe4   :  { %335 = vsyncadd [#allocation3], 4294967040 }
  0xe5   :  { %277 = vsyncpa [#allocation3], 1 }

</bundles_post_ra>
